<compile_context>
chip_gen: v5e
topology: v5e:2x2
jax: 0.10.0
libtpu: 0.0.40
codegen_flags: <defaults>
</compile_context>

<pallas_src>
import functools

import jax
import jax.numpy as jnp
from jax.experimental import pallas as pl
from jax.experimental.pallas import tpu as pltpu

NEURON_VTH = 0.5
THRESH = 1.0
tau_m = 0.03
tau_s = tau_m / 4.0
beta = tau_m / tau_s                            # = 4.0
V0_PARAM = 1.0 / (beta - 1.0) * beta ** (beta / (beta - 1.0))

_SUBLANE = 8
_LANE = 128


def _varyr_kernel(x_ref, w_ref, b_ref, np_ref, cdec_ref, vdec_ref,
                  cur_ref, mem_ref, spk_ref,
                  cur_out, mem_out, spk_out):
    # ops(in_spike): Linear layer -> MXU matmul.  weight/bias are already
    # scaled by V0_param at init; thresh == 1 is folded away.
    psp = jnp.dot(x_ref[...], w_ref[...],
                  preferred_element_type=jnp.float32) + b_ref[...]

    n_p = np_ref[...]          # (1, tn) broadcasts over the (tb, tn) batch tile
    c_decay = cdec_ref[...]
    v_decay = vdec_ref[...]

    current = cur_ref[...]
    mem = mem_ref[...]
    spike = spk_ref[...]

    # current = current * c_decay + (1 - n_p * mem / thresh) * V0 * ops(in_spike)
    new_current = current * c_decay + (1.0 - n_p * mem) * psp
    # mem = v_decay * mem * (1 - spike) + current
    new_mem = v_decay * mem * (1.0 - spike) + new_current
    # spike = (mem > NEURON_VTH).float()   (PseudoSpikeRect forward)
    new_spike = (new_mem > NEURON_VTH).astype(jnp.float32)

    cur_out[...] = new_current
    mem_out[...] = new_mem
    spk_out[...] = new_spike


def _round_up(x, m):
    return (x + m - 1) // m * m


def _pad2(x, rows, cols):
    r, c = x.shape
    if r == rows and c == cols:
        return x
    return jnp.pad(x, ((0, rows - r), (0, cols - c)))


@functools.partial(jax.jit, static_argnames=("matmul_dtype",))
def varyr_update(in_spike, weight, bias, n_p, c_decay, v_decay,
                 current, mem, spike, *, matmul_dtype=None):
    """One varyR_update step.

    weight: [D, N] = V0_param * Linear.weight.T  (pre-scaled & pre-transposed)
    bias:   [1, N] = V0_param * Linear.bias
    All other tensors as in the PyTorch module.  Returns (current, mem, spike).
    matmul_dtype: optionally jnp.bfloat16 to halve the weight HBM stream and
    use the native bf16 MXU path on v6e/v7x (in_spike is {0,1} -> lossless).
    """
    B, D = in_spike.shape
    N = weight.shape[1]
    f32 = jnp.float32

    # --- lane/sublane-dense padding (wrapper-side; sliced off at the end) ---
    Bp = _round_up(B, _SUBLANE)
    Np = _round_up(N, _LANE)
    tb = min(Bp, 256)
    Bp = _round_up(Bp, tb)
    tn = min(Np, 512)
    Np = _round_up(Np, tn)

    x_p = _pad2(in_spike.astype(f32), Bp, D)
    w_p = _pad2(weight.astype(f32), D, Np)
    if matmul_dtype is not None:
        x_p = x_p.astype(matmul_dtype)
        w_p = w_p.astype(matmul_dtype)
    b_p = _pad2(bias.astype(f32), 1, Np)
    np_p = _pad2(n_p.astype(f32), 1, Np)
    cd_p = _pad2(c_decay.astype(f32), 1, Np)
    vd_p = _pad2(v_decay.astype(f32), 1, Np)
    cur_p = _pad2(current.astype(f32), Bp, Np)
    mem_p = _pad2(mem.astype(f32), Bp, Np)
    spk_p = _pad2(spike.astype(f32), Bp, Np)

    grid = (Bp // tb, Np // tn)

    state_spec = pl.BlockSpec((tb, tn), lambda i, j: (i, j))
    param_spec = pl.BlockSpec((1, tn), lambda i, j: (0, j))

    out_shapes = (
        jax.ShapeDtypeStruct((Bp, Np), f32),
        jax.ShapeDtypeStruct((Bp, Np), f32),
        jax.ShapeDtypeStruct((Bp, Np), f32),
    )

    cur_o, mem_o, spk_o = pl.pallas_call(
        _varyr_kernel,
        out_shape=out_shapes,
        grid=grid,
        in_specs=[
            pl.BlockSpec((tb, D), lambda i, j: (i, 0)),   # in_spike
            pl.BlockSpec((D, tn), lambda i, j: (0, j)),   # weight (V0-scaled)
            param_spec,                                   # bias (V0-scaled)
            param_spec,                                   # n_p
            param_spec,                                   # c_decay
            param_spec,                                   # v_decay
            state_spec,                                   # current
            state_spec,                                   # mem
            state_spec,                                   # spike
        ],
        out_specs=(state_spec, state_spec, state_spec),
        # update current/mem/spike in place (caller may donate state buffers)
        input_output_aliases={6: 0, 7: 1, 8: 2},
        compiler_params=pltpu.CompilerParams(
            dimension_semantics=("parallel", "parallel")),
    )(x_p, w_p, b_p, np_p, cd_p, vd_p, cur_p, mem_p, spk_p)

    if (Bp, Np) != (B, N):
        cur_o = cur_o[:B, :N]
        mem_o = mem_o[:B, :N]
        spk_o = spk_o[:B, :N]
    return cur_o, mem_o, spk_o


def reference(in_spike, weight_raw, bias_raw, n_p, c_decay, v_decay,
              current, mem, spike):
    psp = in_spike @ weight_raw + bias_raw
    new_current = current * c_decay + (1.0 - n_p * mem / THRESH) * V0_PARAM * psp
    new_mem = v_decay * mem * (1.0 - spike) + new_current
    new_spike = (new_mem > NEURON_VTH).astype(jnp.float32)
    return new_current, new_mem, new_spike


if __name__ == "__main__":
    B, D, N = 8, 32, 32          # batch, input dim, n_neuron

    key = jax.random.PRNGKey(0)
    k_x, k_w, k_b, k_c, k_m, k_s = jax.random.split(key, 6)

    # parameter init (shapes from __init__ / Linear `ops`)
    weight_raw = jax.random.normal(k_w, (D, N), jnp.float32) * 0.1
    bias_raw = jax.random.normal(k_b, (1, N), jnp.float32) * 0.01
    # one-time fold of V0_param (and thresh == 1) into the Linear parameters
    weight = V0_PARAM * weight_raw
    bias = V0_PARAM * bias_raw
    n_p = 0.1 * jnp.ones((1, N), jnp.float32)       # init_np
    c_decay = 0.5 * jnp.ones((1, N), jnp.float32)   # init_cdecay
    v_decay = 0.75 * jnp.ones((1, N), jnp.float32)  # init_vdecay

    # example state / input
    in_spike = (jax.random.uniform(k_x, (B, D)) > 0.5).astype(jnp.float32)
    current = jax.random.normal(k_c, (B, N), jnp.float32) * 0.1
    mem = jax.random.normal(k_m, (B, N), jnp.float32) * 0.1
    spike = (jax.random.uniform(k_s, (B, N)) > 0.5).astype(jnp.float32)

    # f32 matmul path: exact vs reference
    out = varyr_update(in_spike, weight, bias, n_p, c_decay, v_decay,
                       current, mem, spike)
    out = jax.block_until_ready(out)

    ref = reference(in_spike, weight_raw, bias_raw, n_p, c_decay, v_decay,
                    current, mem, spike)
    for o, r in zip(out, ref):
        assert o.shape == r.shape, "shape mismatch vs reference"
        assert jnp.allclose(o, r, atol=1e-5, rtol=1e-5), "mismatch vs reference"

    print("KERNEL_OK")
</pallas_src>

<mosaic_0001>
module attributes {stable_mosaic.version = 11 : i64} {
  func.func @_varyr_kernel(%arg0: i32, %arg1: i32, %arg2: memref<8x32xf32, #tpu.memory_space<vmem>>, %arg3: memref<32x128xf32, #tpu.memory_space<vmem>>, %arg4: memref<1x128xf32, #tpu.memory_space<vmem>>, %arg5: memref<1x128xf32, #tpu.memory_space<vmem>>, %arg6: memref<1x128xf32, #tpu.memory_space<vmem>>, %arg7: memref<1x128xf32, #tpu.memory_space<vmem>>, %arg8: memref<8x128xf32, #tpu.memory_space<vmem>>, %arg9: memref<8x128xf32, #tpu.memory_space<vmem>>, %arg10: memref<8x128xf32, #tpu.memory_space<vmem>>, %arg11: memref<8x128xf32, #tpu.memory_space<vmem>>, %arg12: memref<8x128xf32, #tpu.memory_space<vmem>>, %arg13: memref<8x128xf32, #tpu.memory_space<vmem>>) attributes {dimension_semantics = [#tpu.dimension_semantics<parallel>, #tpu.dimension_semantics<parallel>], iteration_bounds = array<i64: 1, 1>, scalar_prefetch = 0 : i64, scratch_operands = 0 : i64, tpu.core_type = #tpu.core_type<tc>, window_params = [{transform_indices = @transform_0, window_bounds = array<i64: 8, 32>}, {transform_indices = @transform_1, window_bounds = array<i64: 32, 128>}, {transform_indices = @transform_2, window_bounds = array<i64: 1, 128>}, {transform_indices = @transform_3, window_bounds = array<i64: 1, 128>}, {transform_indices = @transform_4, window_bounds = array<i64: 1, 128>}, {transform_indices = @transform_5, window_bounds = array<i64: 1, 128>}, {transform_indices = @transform_6, window_bounds = array<i64: 8, 128>}, {transform_indices = @transform_7, window_bounds = array<i64: 8, 128>}, {transform_indices = @transform_8, window_bounds = array<i64: 8, 128>}, {transform_indices = @transform_9, window_bounds = array<i64: 8, 128>}, {transform_indices = @transform_10, window_bounds = array<i64: 8, 128>}, {transform_indices = @transform_11, window_bounds = array<i64: 8, 128>}]} {
    %c0 = arith.constant 0 : index
    %c0_0 = arith.constant 0 : index
    %0 = vector.load %arg2[%c0, %c0_0] : memref<8x32xf32, #tpu.memory_space<vmem>>, vector<8x32xf32>
    %c0_1 = arith.constant 0 : index
    %c0_2 = arith.constant 0 : index
    %1 = vector.load %arg3[%c0_1, %c0_2] : memref<32x128xf32, #tpu.memory_space<vmem>>, vector<32x128xf32>
    %cst = arith.constant dense<0.000000e+00> : vector<8x128xf32>
    %2 = tpu.matmul %0, %1, %cst {dimension_numbers = #tpu.dot_dimension_numbers<[1], [0], [0], [1], [0, 0, 1, 1], [], []>} : vector<8x32xf32>, vector<32x128xf32>, vector<8x128xf32> -> vector<8x128xf32>
    %c0_3 = arith.constant 0 : index
    %c0_4 = arith.constant 0 : index
    %3 = vector.load %arg4[%c0_3, %c0_4] : memref<1x128xf32, #tpu.memory_space<vmem>>, vector<1x128xf32>
    %4 = vector.broadcast %3 : vector<1x128xf32> to vector<8x128xf32>
    %5 = arith.addf %2, %4 : vector<8x128xf32>
    %c0_5 = arith.constant 0 : index
    %c0_6 = arith.constant 0 : index
    %6 = vector.load %arg5[%c0_5, %c0_6] : memref<1x128xf32, #tpu.memory_space<vmem>>, vector<1x128xf32>
    %c0_7 = arith.constant 0 : index
    %c0_8 = arith.constant 0 : index
    %7 = vector.load %arg6[%c0_7, %c0_8] : memref<1x128xf32, #tpu.memory_space<vmem>>, vector<1x128xf32>
    %c0_9 = arith.constant 0 : index
    %c0_10 = arith.constant 0 : index
    %8 = vector.load %arg7[%c0_9, %c0_10] : memref<1x128xf32, #tpu.memory_space<vmem>>, vector<1x128xf32>
    %c0_11 = arith.constant 0 : index
    %c0_12 = arith.constant 0 : index
    %9 = vector.load %arg8[%c0_11, %c0_12] : memref<8x128xf32, #tpu.memory_space<vmem>>, vector<8x128xf32>
    %c0_13 = arith.constant 0 : index
    %c0_14 = arith.constant 0 : index
    %10 = vector.load %arg9[%c0_13, %c0_14] : memref<8x128xf32, #tpu.memory_space<vmem>>, vector<8x128xf32>
    %c0_15 = arith.constant 0 : index
    %c0_16 = arith.constant 0 : index
    %11 = vector.load %arg10[%c0_15, %c0_16] : memref<8x128xf32, #tpu.memory_space<vmem>>, vector<8x128xf32>
    %12 = vector.broadcast %7 : vector<1x128xf32> to vector<8x128xf32>
    %13 = arith.mulf %9, %12 : vector<8x128xf32>
    %14 = vector.broadcast %6 : vector<1x128xf32> to vector<8x128xf32>
    %15 = arith.mulf %14, %10 : vector<8x128xf32>
    %cst_17 = arith.constant 1.000000e+00 : f32
    %16 = vector.broadcast %cst_17 : f32 to vector<8x128xf32>
    %17 = arith.subf %16, %15 : vector<8x128xf32>
    %18 = arith.mulf %17, %5 : vector<8x128xf32>
    %19 = arith.addf %13, %18 : vector<8x128xf32>
    %20 = vector.broadcast %8 : vector<1x128xf32> to vector<8x128xf32>
    %21 = arith.mulf %20, %10 : vector<8x128xf32>
    %cst_18 = arith.constant 1.000000e+00 : f32
    %22 = vector.broadcast %cst_18 : f32 to vector<8x128xf32>
    %23 = arith.subf %22, %11 : vector<8x128xf32>
    %24 = arith.mulf %21, %23 : vector<8x128xf32>
    %25 = arith.addf %24, %19 : vector<8x128xf32>
    %cst_19 = arith.constant 5.000000e-01 : f32
    %26 = vector.broadcast %cst_19 : f32 to vector<8x128xf32>
    %27 = arith.cmpf ogt, %25, %26 : vector<8x128xf32>
    %28 = arith.extui %27 : vector<8x128xi1> to vector<8x128xi32>
    %29 = arith.sitofp %28 : vector<8x128xi32> to vector<8x128xf32>
    %c0_20 = arith.constant 0 : index
    %c0_21 = arith.constant 0 : index
    %30 = vector.load %arg11[%c0_20, %c0_21] : memref<8x128xf32, #tpu.memory_space<vmem>>, vector<8x128xf32>
    tpu.vector_store %arg11[%c0_20, %c0_21], %19 {strides = array<i32>} : memref<8x128xf32, #tpu.memory_space<vmem>>, vector<8x128xf32>,
    %c0_22 = arith.constant 0 : index
    %c0_23 = arith.constant 0 : index
    %31 = vector.load %arg12[%c0_22, %c0_23] : memref<8x128xf32, #tpu.memory_space<vmem>>, vector<8x128xf32>
    tpu.vector_store %arg12[%c0_22, %c0_23], %25 {strides = array<i32>} : memref<8x128xf32, #tpu.memory_space<vmem>>, vector<8x128xf32>,
    %c0_24 = arith.constant 0 : index
    %c0_25 = arith.constant 0 : index
    %32 = vector.load %arg13[%c0_24, %c0_25] : memref<8x128xf32, #tpu.memory_space<vmem>>, vector<8x128xf32>
    tpu.vector_store %arg13[%c0_24, %c0_25], %29 {strides = array<i32>} : memref<8x128xf32, #tpu.memory_space<vmem>>, vector<8x128xf32>,
    return
  }
  func.func @transform_0(%arg0: i32, %arg1: i32) -> (i32, i32) {
    %c0_i32 = arith.constant 0 : i32
    %c0_i32_0 = arith.constant 0 : i32
    return %arg0, %c0_i32 : i32, i32
  }
  func.func @transform_1(%arg0: i32, %arg1: i32) -> (i32, i32) {
    %c0_i32 = arith.constant 0 : i32
    %c0_i32_0 = arith.constant 0 : i32
    return %c0_i32, %arg1 : i32, i32
  }
  func.func @transform_2(%arg0: i32, %arg1: i32) -> (i32, i32) {
    %c0_i32 = arith.constant 0 : i32
    %c0_i32_0 = arith.constant 0 : i32
    return %c0_i32, %arg1 : i32, i32
  }
  func.func @transform_3(%arg0: i32, %arg1: i32) -> (i32, i32) {
    %c0_i32 = arith.constant 0 : i32
    %c0_i32_0 = arith.constant 0 : i32
    return %c0_i32, %arg1 : i32, i32
  }
  func.func @transform_4(%arg0: i32, %arg1: i32) -> (i32, i32) {
    %c0_i32 = arith.constant 0 : i32
    %c0_i32_0 = arith.constant 0 : i32
    return %c0_i32, %arg1 : i32, i32
  }
  func.func @transform_5(%arg0: i32, %arg1: i32) -> (i32, i32) {
    %c0_i32 = arith.constant 0 : i32
    %c0_i32_0 = arith.constant 0 : i32
    return %c0_i32, %arg1 : i32, i32
  }
  func.func @transform_6(%arg0: i32, %arg1: i32) -> (i32, i32) {
    %c0_i32 = arith.constant 0 : i32
    return %arg0, %arg1 : i32, i32
  }
  func.func @transform_7(%arg0: i32, %arg1: i32) -> (i32, i32) {
    %c0_i32 = arith.constant 0 : i32
    return %arg0, %arg1 : i32, i32
  }
  func.func @transform_8(%arg0: i32, %arg1: i32) -> (i32, i32) {
    %c0_i32 = arith.constant 0 : i32
    return %arg0, %arg1 : i32, i32
  }
  func.func @transform_9(%arg0: i32, %arg1: i32) -> (i32, i32) {
    %c0_i32 = arith.constant 0 : i32
    return %arg0, %arg1 : i32, i32
  }
  func.func @transform_10(%arg0: i32, %arg1: i32) -> (i32, i32) {
    %c0_i32 = arith.constant 0 : i32
    return %arg0, %arg1 : i32, i32
  }
  func.func @transform_11(%arg0: i32, %arg1: i32) -> (i32, i32) {
    %c0_i32 = arith.constant 0 : i32
    return %arg0, %arg1 : i32, i32
  }
}

</mosaic_0001>

<bundles_post_ra>
// kernel: varyr_update.1
= control target key start
LH: loop header
LB: loop body
LE: loop exit
PB: predicated region body
PF: predicated region fallthrough
CT: control target
= control target key end

     0   :  { %vm44_vm0 = vcmask 261120   ;;  %v117_v23 = vmov 0.0   ;;  %s223_s1 = inlined_call_operand.vmem [shape: f32[32,128], index: 1, kind: input, shape index: {}]   ;;  %s224_s2 = inlined_call_operand.vmem [shape: f32[1,128], index: 2, kind: input, shape index: {}]   ;;  %s225_s3 = inlined_call_operand.vmem [shape: f32[1,128], index: 3, kind: input, shape index: {}]   ;;  %s226_s4 = inlined_call_operand.vmem [shape: f32[1,128], index: 4, kind: input, shape index: {}]   ;;  %s227_s0 = inlined_call_operand.vmem [shape: f32[8,32], index: 0, kind: input, shape index: {}]   ;;  %s228_s5 = inlined_call_operand.vmem [shape: f32[1,128], index: 5, kind: input, shape index: {}]   ;;  %s229_s7 = inlined_call_operand.vmem [shape: f32[8,128], index: 7, kind: input, shape index: {}, may-alias: {7,10}]   ;;  %s230_s8 = inlined_call_operand.vmem [shape: f32[8,128], index: 8, kind: input, shape index: {}, may-alias: {8,11}]   ;;  %s231_s6 = inlined_call_operand.vmem [shape: f32[8,128], index: 6, kind: input, shape index: {}, may-alias: {6,9}]   ;;  %s232_s9 = inlined_call_operand.vmem [shape: f32[8,128], index: 9, kind: output, shape index: {0}, may-alias: {6,9}]   ;;  %s233_s10 = inlined_call_operand.vmem [shape: f32[8,128], index: 10, kind: output, shape index: {1}, may-alias: {7,10}]   ;;  %s234_s11 = inlined_call_operand.vmem [shape: f32[8,128], index: 11, kind: output, shape index: {2}, may-alias: {8,11}]  }
   0x1   :  { %v39_v0 = vld [vmem:[%s223_s1 + $0x18] sm:$0xff]  ;;  %v38_v1 = vld [vmem:[%s223_s1 + $0x10] sm:$0xff]  ;;  %v37_v2 = vld [vmem:[%s223_s1 + $0x8] sm:$0xff] }
   0x2   :  { %60 = vmatpush.msra.mxu0 %v39_v0  ;;  %v36_v3 = vld [vmem:[%s223_s1] sm:$0xff] }
   0x3   :  { %v35_v4 = vld [vmem:[%s227_s0] sm:$0xff] }
   0x4   :  { %61 = vmatpush.msra.mxu0 %v38_v1  ;;  %v115_v5 = vld [vmem:[%s225_s3] ss:$0 sm:$0xff] }
   0x5   :  { %v72_v6 = vld [vmem:[%s229_s7] sm:$0xff] }
   0x6   :  { %62 = vmatpush.msra.mxu0 %v37_v2  ;;  %v81_v7 = vmul.f32 %v115_v5, %v72_v6  ;;  %v116_v8 = vld [vmem:[%s228_s5] ss:$0 sm:$0xff] }
   0x7   :  { %v73_v9 = vld [vmem:[%s230_s8] sm:$0xff]  ;;  %v88_v14 = vmul.f32 %v116_v8, %v72_v6 }
   0x8   :  { %63 = vmatpush.msra.mxu0 %v36_v3  ;;  %v113_v10 = vld [vmem:[%s224_s2] ss:$0 sm:$0xff]  ;;  %v82_v13 = vsub.f32 1.0, %v81_v7  ;;  %v89_v15 = vsub.f32 1.0, %v73_v9 }
   0x9   :  { %110 = vmatmul.msk.f32.vlgmr.msra.gmra.mxu0 %vm44_vm0, %v35_v4  ;;  %v114_v11 = vld [vmem:[%s226_s4] ss:$0 sm:$0xff] }
   0xa   :  { %v71_v12 = vld [vmem:[%s231_s6] sm:$0xff]  ;;  %v90_v20 = vmul.f32 %v89_v15, %v88_v14 }
   0xb   :  { %v77_v18 = vmul.f32 %v114_v11, %v71_v12 }
  0x86   :  { %v65_v16 = vpop.f32.mrf.mxu0 }
  0x87   :  { %v66_v17 = vadd.f32 %v113_v10, %v65_v16 }
  0x89   :  { %v83_v19 = vmul.f32 %v82_v13, %v66_v17 }
  0x8b   :  { %v84_v21 = vadd.f32 %v83_v19, %v77_v18 }
  0x8d   :  { %v91_v22 = vadd.f32 %v90_v20, %v84_v21  ;;  %95 = vst [vmem:[%s232_s9] sm:$0xff] %v84_v21 }
  0x8f   :  { %vm92_vm1 = vcmp.gt.f32.partialorder %v91_v22, 0.5  ;;  %96 = vst [vmem:[%s233_s10] sm:$0xff] %v91_v22 }
  0x90   :  { %v111_v24 = vsel %vm92_vm1, 1.0, %v117_v23 }
  0x91   :  { %97 = vst [vmem:[%s234_s11] sm:$0xff] %v111_v24 }

</bundles_post_ra>
